<compile_context>
chip_gen: v5e
topology: v5e:2x2
jax: 0.10.0
libtpu: 0.0.40
codegen_flags: <defaults>
</compile_context>

<pallas_src>
import math
from functools import partial

import jax
import jax.numpy as jnp
from jax.experimental import pallas as pl
from jax.experimental.pallas import tpu as pltpu


VGG16_LAYER_NAMES = [
    'conv1_1', 'relu1_1', 'conv1_2', 'relu1_2', 'maxpool1',
    'conv2_1', 'relu2_1', 'conv2_2', 'relu2_2', 'maxpool2',
    'conv3_1', 'relu3_1', 'conv3_2', 'relu3_2', 'conv3_3', 'relu3_3', 'maxpool3',
    'conv4_1', 'relu4_1', 'conv4_2', 'relu4_2', 'conv4_3', 'relu4_3', 'maxpool4',
    'conv5_1', 'relu5_1', 'conv5_2', 'relu5_2', 'conv5_3', 'relu5_3', 'maxpool5',
]

# (in_channels, out_channels) of each conv in torchvision vgg16.features
VGG16_CONV_CHANNELS = {
    'conv1_1': (3, 64),    'conv1_2': (64, 64),
    'conv2_1': (64, 128),  'conv2_2': (128, 128),
    'conv3_1': (128, 256), 'conv3_2': (256, 256), 'conv3_3': (256, 256),
    'conv4_1': (256, 512), 'conv4_2': (512, 512), 'conv4_3': (512, 512),
    'conv5_1': (512, 512), 'conv5_2': (512, 512), 'conv5_3': (512, 512),
}

IMAGENET_MEAN = (0.485, 0.456, 0.406)
IMAGENET_STD = (0.229, 0.224, 0.225)


def _round_up(v, m):
    return (v + m - 1) // m * m


def _row_tile(h, w, max_rows=2048):
    """Largest divisor d of h such that d * w <= max_rows (at least 1)."""
    best = 1
    for d in range(1, h + 1):
        if h % d == 0 and d * w <= max_rows:
            best = d
    return best


def _choose_conv_tile(h, w, cin, cout_t, act_isz, n_out,
                      budget=12 * 2**20, max_m=8192):
    """VMEM-aware conv row tile: the largest divisor of h whose working set
    (double-buffered body/halo/out blocks, stitched halo buffer, f32 accumulator
    chain, double-buffered weight tile) fits a 12 MiB budget.  12 MiB keeps the
    call inside v5e's 16 MiB default scoped-VMEM limit; v6e/v7x default to 32 MiB,
    so no vmem_limit_bytes override is needed on any generation."""
    wp = _round_up(w + 2, 8)
    fixed = 2 * 9 * cin * cout_t * act_isz + 2 * cout_t * 4
    best = 1
    for tr in range(1, h + 1):
        if h % tr or tr * wp > max_m:
            continue
        per = (2 * tr * w * cin * act_isz               # body tile, double buffered
               + 4 * w * cin * act_isz                  # 2 halo rows, double buffered
               + 2 * n_out * tr * w * cout_t * act_isz  # output tile(s), double buffered
               + (tr + 3) * wp * cin * act_isz          # stitched halo buffer
               + 2 * tr * wp * cout_t * 4               # f32 acc + in-flight matmul result
               + tr * wp * cin * act_isz)               # headroom for a buffered tile copy
        if fixed + per <= budget:
            best = tr
    return best, wp


# ----------------------------- Pallas kernels ----------------------------- #

def _conv3x3_kernel(top_ref, body_ref, bot_ref, w_ref, b_ref, *refs,
                    apply_relu, emit_pre):
    # top_ref/bot_ref: (1, W, Cin) halo rows (clamped; zeroed at the image edges)
    # body_ref:        (TR, W, Cin) row tile of the activation
    # w_ref:           (9, Cin, COT) tap-major weights (constant index map)
    # b_ref:           (1, COT) f32 bias
    # outputs:         o_ref (TR, W, COT) [, opre_ref (TR, W, COT) pre-ReLU copy]
    # buf:             (TR+3, Wp, Cin) stitched, width-padded tile (+1 slack row)
    if emit_pre:
        o_ref, opre_ref, buf = refs
    else:
        o_ref, buf = refs
        opre_ref = None
    tr, w_out, cout = o_ref.shape
    cin = body_ref.shape[-1]
    wp = buf.shape[1]
    r = pl.program_id(2)
    n_rt = pl.num_programs(2)
    zdt = buf.dtype

    # --- stitch the halo'd row tile into a width-padded contiguous buffer ---
    buf[:, 0:1, :] = jnp.zeros((tr + 3, 1, cin), zdt)                         # left zero pad
    buf[:, w_out + 1:wp, :] = jnp.zeros((tr + 3, wp - w_out - 1, cin), zdt)   # right pad + slack
    buf[tr + 2:tr + 3, 1:w_out + 1, :] = jnp.zeros((1, w_out, cin), zdt)      # slack row
    buf[0:1, 1:w_out + 1, :] = top_ref[...].astype(zdt)
    buf[1:tr + 1, 1:w_out + 1, :] = body_ref[...].astype(zdt)
    buf[tr + 1:tr + 2, 1:w_out + 1, :] = bot_ref[...].astype(zdt)

    @pl.when(r == 0)
    def _():  # first row tile: the top halo is the zero border
        buf[0:1, :, :] = jnp.zeros((1, wp, cin), zdt)

    @pl.when(r == n_rt - 1)
    def _():  # last row tile: the bottom halo is the zero border
        buf[tr + 1:tr + 2, :, :] = jnp.zeros((1, wp, cin), zdt)

    # --- 9 taps as contiguous flat-offset windows -> MXU, SSA accumulation ---
    xf = buf[...].reshape((tr + 3) * wp, cin)       # free: wp is a multiple of 8
    m = tr * wp
    acc = None
    for ky in range(3):
        for kx in range(3):
            off = ky * wp + kx
            contrib = jnp.dot(xf[off:off + m, :], w_ref[3 * ky + kx],
                              preferred_element_type=jnp.float32)
            acc = contrib if acc is None else acc + contrib
    y = (acc + b_ref[...]).reshape(tr, wp, cout)[:, :w_out, :]   # drop wrap-around cols once
    if emit_pre:
        opre_ref[...] = y.astype(opre_ref.dtype)
    if apply_relu:
        y = jnp.maximum(y, 0.0)
    o_ref[...] = y.astype(o_ref.dtype)


def _dense_bias_relu_kernel(x_ref, w_ref, b_ref, *refs, apply_relu, emit_pre):
    # conv1_1 path: x_ref (TR, W, K=27), w_ref (27, Cout), b_ref (1, Cout)
    if emit_pre:
        o_ref, opre_ref = refs
    else:
        o_ref, = refs
        opre_ref = None
    tr, w_out, k = x_ref.shape
    cout = o_ref.shape[-1]
    patch = x_ref[...].reshape(tr * w_out, k)
    y = jnp.dot(patch, w_ref[...], preferred_element_type=jnp.float32) + b_ref[...]
    y = y.reshape(tr, w_out, cout)
    if emit_pre:
        opre_ref[...] = y.astype(opre_ref.dtype)
    if apply_relu:
        y = jnp.maximum(y, 0.0)
    o_ref[...] = y.astype(o_ref.dtype)


def _pool2x2_kernel(x_ref, o_ref, *, use_avg):
    # x_ref: (2*PR, W, C) -> o_ref: (PR, W//2, C); 2x2 window reduced in-kernel.
    xv = x_ref[...].astype(jnp.float32)
    pr2, w, c = xv.shape
    pr, wo = pr2 // 2, w // 2
    xr = xv.reshape(pr, 2, w, c)
    top, bot = xr[:, 0], xr[:, 1]
    v = (top + bot) if use_avg else jnp.maximum(top, bot)
    vr = v.reshape(pr, wo, 2, c)
    left, right = vr[:, :, 0, :], vr[:, :, 1, :]
    o = (left + right) * 0.25 if use_avg else jnp.maximum(left, right)
    o_ref[...] = o.astype(o_ref.dtype)


def _relu_kernel(x_ref, o_ref):
    # Fallback only (ReLU is normally fused into the conv epilogue).
    o_ref[...] = jnp.maximum(x_ref[...].astype(jnp.float32), 0.0).astype(o_ref.dtype)


def _norm_kernel(x_ref, m_ref, s_ref, o_ref):
    # x_ref: (TR, W, 3), m_ref / s_ref: (1, 1, 3)
    o_ref[...] = ((x_ref[...].astype(jnp.float32) - m_ref[...]) * s_ref[...]).astype(o_ref.dtype)


# ------------------------------ op wrappers -------------------------------- #

_PARALLEL2 = pltpu.CompilerParams(dimension_semantics=("parallel", "parallel"))
_PARALLEL3 = pltpu.CompilerParams(dimension_semantics=("parallel", "parallel", "arbitrary"))


def conv3x3_pallas(x, w_taps, b_row, *, apply_relu, emit_pre):
    """3x3 'same' conv + bias (+ fused ReLU, + optional pre-ReLU hooked output).

    x: (N,H,W,Cin) -> (N,H,W,Cout).  No halo/padded copy of the activation is
    materialized in HBM: the kernel reads the activation through a body block
    plus two 1-row halo blocks and builds the zero borders in VMEM.
    """
    N, H, W, Cin = x.shape
    Cout = w_taps.shape[-1]
    COT = Cout if Cout <= 256 else 256            # Cout tiling for the 512-ch layers
    n_co = Cout // COT
    isz = jnp.dtype(x.dtype).itemsize
    TR, Wp = _choose_conv_tile(H, W, Cin, COT, isz, 2 if emit_pre else 1)
    n_rt = H // TR

    top_map = lambda n, co, r: (n, jnp.maximum(r * TR - 1, 0), 0, 0)
    body_map = lambda n, co, r: (n, r, 0, 0)
    bot_map = lambda n, co, r: (n, jnp.minimum((r + 1) * TR, H - 1), 0, 0)
    out_spec = pl.BlockSpec((None, TR, W, COT), lambda n, co, r: (n, r, 0, co))

    out_sds = jax.ShapeDtypeStruct((N, H, W, Cout), x.dtype)
    out_shape = (out_sds, out_sds) if emit_pre else out_sds
    out_specs = (out_spec, out_spec) if emit_pre else out_spec

    wsz = jnp.dtype(w_taps.dtype).itemsize
    bytes_accessed = (N * n_co * H * W * Cin * isz
                      + N * n_co * 9 * Cin * COT * wsz
                      + (2 if emit_pre else 1) * N * H * W * Cout * isz)

    return pl.pallas_call(
        partial(_conv3x3_kernel, apply_relu=apply_relu, emit_pre=emit_pre),
        out_shape=out_shape,
        grid=(N, n_co, n_rt),
        in_specs=[
            pl.BlockSpec((None, 1, W, Cin), top_map),
            pl.BlockSpec((None, TR, W, Cin), body_map),
            pl.BlockSpec((None, 1, W, Cin), bot_map),
            pl.BlockSpec((9, Cin, COT), lambda n, co, r: (0, 0, co)),
            pl.BlockSpec((1, COT), lambda n, co, r: (0, co)),
        ],
        out_specs=out_specs,
        scratch_shapes=[pltpu.VMEM((TR + 3, Wp, Cin), x.dtype)],
        compiler_params=_PARALLEL3,
        cost_estimate=pl.CostEstimate(flops=2 * 9 * N * H * W * Cin * Cout,
                                      transcendentals=0,
                                      bytes_accessed=bytes_accessed),
    )(x, x, x, w_taps, b_row)


def conv3x3_smallcin_pallas(x, w27, b_row, *, apply_relu, emit_pre):
    """conv1_1 path: collapse 3x3xCin=3 taps into a single K=27 matmul."""
    N, H, W, Cin = x.shape
    K, Cout = w27.shape
    xp = jnp.pad(x, ((0, 0), (1, 1), (1, 1), (0, 0)))
    patches = jnp.concatenate(
        [xp[:, ky:ky + H, kx:kx + W, :] for ky in range(3) for kx in range(3)],
        axis=-1)                                       # (N, H, W, 27); 3-ch input -> cheap
    TR = _row_tile(H, W)
    n_rt = H // TR
    isz = jnp.dtype(x.dtype).itemsize

    out_spec = pl.BlockSpec((None, TR, W, Cout), lambda n, r: (n, r, 0, 0))
    out_sds = jax.ShapeDtypeStruct((N, H, W, Cout), x.dtype)
    out_shape = (out_sds, out_sds) if emit_pre else out_sds
    out_specs = (out_spec, out_spec) if emit_pre else out_spec

    return pl.pallas_call(
        partial(_dense_bias_relu_kernel, apply_relu=apply_relu, emit_pre=emit_pre),
        out_shape=out_shape,
        grid=(N, n_rt),
        in_specs=[
            pl.BlockSpec((None, TR, W, K), lambda n, r: (n, r, 0, 0)),
            pl.BlockSpec((K, Cout), lambda n, r: (0, 0)),
            pl.BlockSpec((1, Cout), lambda n, r: (0, 0)),
        ],
        out_specs=out_specs,
        compiler_params=_PARALLEL2,
        cost_estimate=pl.CostEstimate(
            flops=2 * N * H * W * K * Cout, transcendentals=0,
            bytes_accessed=N * H * W * K * isz + N * H * W * Cout * isz),
    )(patches, w27, b_row)


def pool2x2_pallas(x, *, use_avg=False):
    """2x2 stride-2 pooling (max or avg).  (N,H,W,C) -> (N,H//2,W//2,C)."""
    N, H, W, C = x.shape
    Ho, Wo = H // 2, W // 2
    x = x[:, :2 * Ho, :2 * Wo, :]
    Wi = 2 * Wo
    PR = _row_tile(Ho, Wo)
    n_rt = Ho // PR
    return pl.pallas_call(
        partial(_pool2x2_kernel, use_avg=use_avg),
        out_shape=jax.ShapeDtypeStruct((N, Ho, Wo, C), x.dtype),
        grid=(N, n_rt),
        in_specs=[pl.BlockSpec((None, 2 * PR, Wi, C), lambda n, r: (n, r, 0, 0))],
        out_specs=pl.BlockSpec((None, PR, Wo, C), lambda n, r: (n, r, 0, 0)),
        compiler_params=_PARALLEL2,
    )(x)


def relu_pallas(x):
    # Fallback only: in VGG16 every ReLU is fused into the preceding conv.
    N, H, W, C = x.shape
    TR = _row_tile(H, W)
    n_rt = H // TR
    return pl.pallas_call(
        _relu_kernel,
        out_shape=jax.ShapeDtypeStruct(x.shape, x.dtype),
        grid=(N, n_rt),
        in_specs=[pl.BlockSpec((None, TR, W, C), lambda n, r: (n, r, 0, 0))],
        out_specs=pl.BlockSpec((None, TR, W, C), lambda n, r: (n, r, 0, 0)),
        compiler_params=_PARALLEL2,
    )(x)


def imagenet_norm_pallas(x):
    # TODO(synk): could be folded into the conv1_1 patch kernel; kept separate since
    # the 3-channel input traffic is negligible compared to the conv layers.
    N, H, W, C = x.shape
    TR = _row_tile(H, W)
    n_rt = H // TR
    mean = jnp.asarray(IMAGENET_MEAN, jnp.float32).reshape(1, 1, C)
    inv_std = (1.0 / jnp.asarray(IMAGENET_STD, jnp.float32)).reshape(1, 1, C)
    return pl.pallas_call(
        _norm_kernel,
        out_shape=jax.ShapeDtypeStruct(x.shape, x.dtype),
        grid=(N, n_rt),
        in_specs=[pl.BlockSpec((None, TR, W, C), lambda n, r: (n, r, 0, 0)),
                  pl.BlockSpec((1, 1, C), lambda n, r: (0, 0, 0)),
                  pl.BlockSpec((1, 1, C), lambda n, r: (0, 0, 0))],
        out_specs=pl.BlockSpec((None, TR, W, C), lambda n, r: (n, r, 0, 0)),
        compiler_params=_PARALLEL2,
    )(x, mean, inv_std)


# ------------------------------ the module --------------------------------- #

class VGG16FeatureExtractor:
    """Pallas-TPU port of the PyTorch VGG16FeatureExtractor forward pass.

    Weights are deterministic synthetic (He-init) stand-ins for the pretrained
    torchvision weights (same shapes / same layer graph).
    """

    def __init__(self, layers, use_avg_pool=False, rescale_img=False,
                 random_crop_image=False, normalize=False,
                 compute_dtype=jnp.bfloat16, key=None):
        if key is None:
            key = jax.random.PRNGKey(0)
        # Truncate the layer list exactly the way the PyTorch module does.
        l_partial = list(layers)
        self.layer_names = []
        self.hooked = []
        for name in VGG16_LAYER_NAMES:
            if len(l_partial) == 0:
                break
            self.layer_names.append(name)
            if name in l_partial:
                self.hooked.append(name)
                l_partial.remove(name)

        self.use_avg_pool = use_avg_pool
        self.normalize = normalize
        self.compute_dtype = compute_dtype
        # TODO(synk): F.interpolate(size=(224,224), mode='nearest') rescale and
        # torchvision random-crop paths are not implemented in this synthetic kernel.
        if rescale_img or random_crop_image:
            raise NotImplementedError("rescale_img / random_crop_image not supported")

        # Deterministic parameter init (shapes identical to torchvision vgg16).
        self.params = {}
        for name in self.layer_names:
            if not name.startswith('conv'):
                continue
            cin, cout = VGG16_CONV_CHANNELS[name]
            key, kw, kb = jax.random.split(key, 3)
            w_oihw = jax.random.normal(kw, (cout, cin, 3, 3), jnp.float32) * math.sqrt(2.0 / (cin * 9))
            b = jax.random.normal(kb, (cout,), jnp.float32) * 0.01
            w_hwio = jnp.transpose(w_oihw, (2, 3, 1, 0))            # (3,3,Cin,Cout) f32
            entry = {'w_hwio': w_hwio, 'b_row': b.reshape(1, cout)}
            if cin == 3:
                entry['w27'] = w_hwio.reshape(9 * cin, cout).astype(compute_dtype)
            else:
                entry['w_taps'] = w_hwio.reshape(9, cin, cout).astype(compute_dtype)
            self.params[name] = entry

    def __call__(self, x_nchw):
        cd = self.compute_dtype
        x = jnp.transpose(x_nchw, (0, 2, 3, 1)).astype(cd)          # NCHW -> NHWC
        if self.normalize:
            x = imagenet_norm_pallas(x)

        activations = {}

        def save(name, val):
            activations[name] = jnp.transpose(val, (0, 3, 1, 2)).astype(jnp.float32)

        names = self.layer_names
        i = 0
        while i < len(names):
            name = names[i]
            if name.startswith('conv'):
                p = self.params[name]
                next_is_relu = (i + 1 < len(names)) and names[i + 1].startswith('relu')
                conv_hooked = name in self.hooked
                # If the conv itself is hooked and a ReLU follows, emit both the
                # pre-ReLU hooked tensor and the post-ReLU activation from the
                # same pallas_call (no standalone ReLU pass).
                want_pre = conv_hooked and next_is_relu
                if 'w27' in p:
                    res = conv3x3_smallcin_pallas(x, p['w27'], p['b_row'],
                                                  apply_relu=next_is_relu,
                                                  emit_pre=want_pre)
                else:
                    res = conv3x3_pallas(x, p['w_taps'], p['b_row'],
                                         apply_relu=next_is_relu,
                                         emit_pre=want_pre)
                if want_pre:
                    x, pre = res
                    save(name, pre)
                else:
                    x = res
                    if conv_hooked:
                        save(name, x)
                if next_is_relu:
                    rname = names[i + 1]
                    if rname in self.hooked:
                        save(rname, x)
                    i += 2
                    continue
            elif name.startswith('relu'):
                # Unreachable for the standard VGG16 layer ordering (kept as fallback).
                x = relu_pallas(x)
                if name in self.hooked:
                    save(name, x)
            else:  # maxpool*
                x = pool2x2_pallas(x, use_avg=self.use_avg_pool)
                if name in self.hooked:
                    save(name, x)
            i += 1
        return activations


# ------------------------------ reference ---------------------------------- #

def _reference_forward(x_nchw, model):
    """Plain-JAX (XLA) reference of the same truncated VGG16 graph.

    Simulates the same storage-dtype casts as the Pallas model (cast after the
    input / norm / each fused conv+ReLU / each pool) so that bf16 runs can be
    compared with a tight tolerance.
    """
    cd = model.compute_dtype

    def q(a):
        return a.astype(cd).astype(jnp.float32)

    x = q(jnp.transpose(x_nchw, (0, 2, 3, 1)))
    if model.normalize:
        mean = jnp.asarray(IMAGENET_MEAN, jnp.float32).reshape(1, 1, 1, 3)
        inv = (1.0 / jnp.asarray(IMAGENET_STD, jnp.float32)).reshape(1, 1, 1, 3)
        x = q((x - mean) * inv)
    acts = {}
    for name in model.layer_names:
        if name.startswith('conv'):
            p = model.params[name]
            x = jax.lax.conv_general_dilated(
                x, q(p['w_hwio']), window_strides=(1, 1), padding='SAME',
                dimension_numbers=('NHWC', 'HWIO', 'NHWC')) + p['b_row'].reshape(1, 1, 1, -1)
        elif name.startswith('relu'):
            x = q(jnp.maximum(x, 0.0))
        else:
            if model.use_avg_pool:
                x = jax.lax.reduce_window(x, 0.0, jax.lax.add,
                                          (1, 2, 2, 1), (1, 2, 2, 1), 'VALID') * 0.25
            else:
                x = jax.lax.reduce_window(x, -jnp.inf, jax.lax.max,
                                          (1, 2, 2, 1), (1, 2, 2, 1), 'VALID')
            x = q(x)
        if name in model.hooked:
            acts[name] = jnp.transpose(q(x), (0, 3, 1, 2))
    return acts


# --------------------------------- main ------------------------------------ #

if __name__ == "__main__":
    key = jax.random.PRNGKey(0)
    x = jax.random.uniform(key, (2, 3, 16, 16), jnp.float32)  # NCHW, RGB image batch

    # 'conv2_1' exercises the dual-output (pre-ReLU hooked + fused-ReLU) path.
    layers = ['relu1_2', 'conv2_1', 'relu2_2', 'relu3_3']
    expected_shapes = {'relu1_2': (2, 64, 16, 16),
                       'conv2_1': (2, 128, 8, 8),
                       'relu2_2': (2, 128, 8, 8),
                       'relu3_3': (2, 256, 4, 4)}

    # Note: the f32 tolerance stays loose-ish because the Pallas MXU dots and the
    # XLA reference convolution may resolve the *default* f32 matmul precision to
    # a different number of bf16 passes on TPU; the comparison is not bit-exact.
    for cd, tol in ((jnp.float32, 1e-2), (jnp.bfloat16, 2e-2)):
        model = VGG16FeatureExtractor(layers, use_avg_pool=False, normalize=True,
                                      compute_dtype=cd, key=jax.random.PRNGKey(0))
        acts = model(x)
        for v in acts.values():
            jax.block_until_ready(v)

        ref = _reference_forward(x, model)
        for name, shape in expected_shapes.items():
            a, r = acts[name], ref[name]
            assert a.shape == shape, (name, a.shape)
            err = float(jnp.max(jnp.abs(a - r)))
            scale = float(jnp.max(jnp.abs(r))) + 1e-6
            assert err / scale < tol, (str(cd), name, err, scale)

    print("KERNEL_OK")
</pallas_src>

<mosaic_0001>
module attributes {stable_mosaic.version = 11 : i64} {
  func.func @_norm_kernel(%arg0: i32, %arg1: i32, %arg2: memref<1x16x16x3xf32, #tpu.memory_space<vmem>>, %arg3: memref<1x1x3xf32, #tpu.memory_space<vmem>>, %arg4: memref<1x1x3xf32, #tpu.memory_space<vmem>>, %arg5: memref<1x16x16x3xf32, #tpu.memory_space<vmem>>) attributes {dimension_semantics = [#tpu.dimension_semantics<parallel>, #tpu.dimension_semantics<parallel>], iteration_bounds = array<i64: 2, 1>, scalar_prefetch = 0 : i64, scratch_operands = 0 : i64, tpu.core_type = #tpu.core_type<tc>, window_params = [{transform_indices = @transform_0, window_bounds = array<i64: 1, 16, 16, 3>}, {pipeline_mode = #tpu.pipeline_mode<synchronous>, transform_indices = @transform_1, window_bounds = array<i64: 1, 1, 3>}, {pipeline_mode = #tpu.pipeline_mode<synchronous>, transform_indices = @transform_2, window_bounds = array<i64: 1, 1, 3>}, {transform_indices = @transform_3, window_bounds = array<i64: 1, 16, 16, 3>}]} {
    %c0 = arith.constant 0 : index
    %c0_0 = arith.constant 0 : index
    %c0_1 = arith.constant 0 : index
    %c0_2 = arith.constant 0 : index
    %0 = vector.load %arg2[%c0, %c0_0, %c0_1, %c0_2] : memref<1x16x16x3xf32, #tpu.memory_space<vmem>>, vector<1x16x16x3xf32>
    %1 = vector.shape_cast %0 : vector<1x16x16x3xf32> to vector<16x16x3xf32>
    %c0_3 = arith.constant 0 : index
    %c0_4 = arith.constant 0 : index
    %c0_5 = arith.constant 0 : index
    %2 = vector.load %arg3[%c0_3, %c0_4, %c0_5] : memref<1x1x3xf32, #tpu.memory_space<vmem>>, vector<1x1x3xf32>
    %3 = vector.broadcast %2 : vector<1x1x3xf32> to vector<16x16x3xf32>
    %4 = arith.subf %1, %3 : vector<16x16x3xf32>
    %c0_6 = arith.constant 0 : index
    %c0_7 = arith.constant 0 : index
    %c0_8 = arith.constant 0 : index
    %5 = vector.load %arg4[%c0_6, %c0_7, %c0_8] : memref<1x1x3xf32, #tpu.memory_space<vmem>>, vector<1x1x3xf32>
    %6 = vector.broadcast %5 : vector<1x1x3xf32> to vector<16x16x3xf32>
    %7 = arith.mulf %4, %6 : vector<16x16x3xf32>
    %c0_9 = arith.constant 0 : index
    %c0_10 = arith.constant 0 : index
    %c0_11 = arith.constant 0 : index
    %c0_12 = arith.constant 0 : index
    %8 = vector.load %arg5[%c0_9, %c0_10, %c0_11, %c0_12] : memref<1x16x16x3xf32, #tpu.memory_space<vmem>>, vector<1x16x16x3xf32>
    %9 = vector.shape_cast %8 : vector<1x16x16x3xf32> to vector<16x16x3xf32>
    %10 = vector.shape_cast %7 : vector<16x16x3xf32> to vector<1x16x16x3xf32>
    tpu.vector_store %arg5[%c0_9, %c0_10, %c0_11, %c0_12], %10 {strides = array<i32>} : memref<1x16x16x3xf32, #tpu.memory_space<vmem>>, vector<1x16x16x3xf32>,
    return
  }
  func.func @transform_0(%arg0: i32, %arg1: i32) -> (i32, i32, i32, i32) {
    %c0_i32 = arith.constant 0 : i32
    %c0_i32_0 = arith.constant 0 : i32
    %c0_i32_1 = arith.constant 0 : i32
    return %arg0, %arg1, %c0_i32, %c0_i32_0 : i32, i32, i32, i32
  }
  func.func @transform_1(%arg0: i32, %arg1: i32) -> (i32, i32, i32) {
    %c0_i32 = arith.constant 0 : i32
    %c0_i32_0 = arith.constant 0 : i32
    %c0_i32_1 = arith.constant 0 : i32
    %c0_i32_2 = arith.constant 0 : i32
    return %c0_i32, %c0_i32_0, %c0_i32_1 : i32, i32, i32
  }
  func.func @transform_2(%arg0: i32, %arg1: i32) -> (i32, i32, i32) {
    %c0_i32 = arith.constant 0 : i32
    %c0_i32_0 = arith.constant 0 : i32
    %c0_i32_1 = arith.constant 0 : i32
    %c0_i32_2 = arith.constant 0 : i32
    return %c0_i32, %c0_i32_0, %c0_i32_1 : i32, i32, i32
  }
  func.func @transform_3(%arg0: i32, %arg1: i32) -> (i32, i32, i32, i32) {
    %c0_i32 = arith.constant 0 : i32
    %c0_i32_0 = arith.constant 0 : i32
    %c0_i32_1 = arith.constant 0 : i32
    return %arg0, %arg1, %c0_i32, %c0_i32_0 : i32, i32, i32, i32
  }
}

</mosaic_0001>

<bundles_post_ra>
// kernel: tpu_custom_call.1
= control target key start
LH: loop header
LB: loop body
LE: loop exit
PB: predicated region body
PF: predicated region fallthrough
CT: control target
= control target key end

     0   :  { %s531_s12 = smov 0   ;;  %s533_s13 = smov 0   ;;  %s738_s0 = inlined_call_operand.vmem [shape: f32[2,16,16,3], index: 0, kind: input, shape index: {}]   ;;  %s739_s1 = inlined_call_operand.vmem [shape: f32[1,1,3], index: 1, kind: input, shape index: {}]   ;;  %s740_s2 = inlined_call_operand.vmem [shape: f32[1,1,3], index: 2, kind: input, shape index: {}]   ;;  %s741_s3 = inlined_call_operand.vmem [shape: f32[2,16,16,3], index: 3, kind: output, shape index: {}]  }
   0x1   :  { %s535_s14 = smov 0  }
   0x2 LB: > { %s25_s15 = sadd.s32 1, %s505_s13  ;;  %p452_p0 = scmp.ge.s32.totalorder %s509_s14, 1  ;;  %s509_s14 = sphi %s535_s14, %s13_s14   ;;  %s505_s13 = sphi %s533_s13, %s743_s13   ;;  %s501_s12 = sphi %s531_s12, %s742_s12  }
   0x3   : > { %p27_p1 = scmp.ge.s32.totalorder %s25_s15, 2  ;;  %p159_p2 = scmp.lt.s32.totalorder %s509_s14, 3 }
   0x5   : > { %s745_s15 = smov (%p27_p1, %s25_s15), 0  ;;  %p160_p3 = pnand %p452_p0, %p159_p2 }
   0x6   : > { %p194_p4 = scmp.lt.s32.totalorder (!%p160_p3), %s501_s12, 1 }
   0x7   : > { %163 = sbr.rel (%p160_p3) target bundleno = 52 (0x34), region = 32 }
   0xc   : > { %s747_s12 = smov (!%p194_p4, %s501_s12), 1  ;;  %v552_v0 = vld [vmem:[%s739_s1] ss:$0 sm:$0xff]  ;;  %vm319_vm0 = vcmask 23552  }
   0xd   : > { %s459_s18 = sshll.u32 %s747_s12, 8  ;;  %v562_v1 = vld [vmem:[%s740_s2] ss:$0 sm:$0xff] }
   0xe   : > { %s557_s21 = scalar_lea.vmem %s738_s0, %s459_s18  ;;  %s576_s26 = scalar_lea.vmem %s741_s3, %s459_s18 }
   0xf   : > { %v215_v2 = vld [vmem:[%s557_s21] sm:$0xff]  ;;  %v216_v3 = vld [vmem:[%s557_s21 + $0x8] sm:$0xff]  ;;  %v217_v4 = vld [vmem:[%s557_s21 + $0x10] sm:$0xff] }
  0x10   : > { %v251_v5 = vsub.f32 %v215_v2, %v552_v0  ;;  %v252_v6 = vsub.f32 %v216_v3, %v552_v0  ;;  %v253_v7 = vsub.f32 %v217_v4, %v552_v0  ;;  %v218_v8 = vld [vmem:[%s557_s21 + $0x18] sm:$0xff]  ;;  %v219_v9 = vld [vmem:[%s557_s21 + $0x20] sm:$0xff]  ;;  %v220_v10 = vld [vmem:[%s557_s21 + $0x28] sm:$0xff] }
  0x11   : > { %v254_v11 = vsub.f32 %v218_v8, %v552_v0  ;;  %v255_v12 = vsub.f32 %v219_v9, %v552_v0  ;;  %v256_v13 = vsub.f32 %v220_v10, %v552_v0  ;;  %v221_v14 = vld [vmem:[%s557_s21 + $0x30] sm:$0xff]  ;;  %v222_v15 = vld [vmem:[%s557_s21 + $0x38] sm:$0xff]  ;;  %v223_v16 = vld [vmem:[%s557_s21 + $0x40] sm:$0xff] }
  0x12   : > { %v287_v17 = vmul.f32 %v562_v1, %v251_v5  ;;  %v288_v18 = vmul.f32 %v562_v1, %v252_v6  ;;  %v289_v19 = vmul.f32 %v562_v1, %v253_v7  ;;  %v257_v20 = vsub.f32 %v221_v14, %v552_v0  ;;  %v224_v21 = vld [vmem:[%s557_s21 + $0x48] sm:$0xff]  ;;  %v225_v24 = vld [vmem:[%s557_s21 + $0x50] sm:$0xff]  ;;  %v226_v27 = vld [vmem:[%s557_s21 + $0x58] sm:$0xff] }
  0x13   : > { %v290_v22 = vmul.f32 %v562_v1, %v254_v11  ;;  %v258_v23 = vsub.f32 %v222_v15, %v552_v0  ;;  %v291_v25 = vmul.f32 %v562_v1, %v255_v12  ;;  %v259_v26 = vsub.f32 %v223_v16, %v552_v0  ;;  %v227_v30 = vld [vmem:[%s557_s21 + $0x60] sm:$0xff]  ;;  %v228_v33 = vld [vmem:[%s557_s21 + $0x68] sm:$0xff]  ;;  %v229_v36 = vld [vmem:[%s557_s21 + $0x70] sm:$0xff] }
  0x14   : > { %320 = vst.msk [vmem:[%s576_s26] sm:$0xff] %vm319_vm0, %v287_v17  ;;  %v292_v28 = vmul.f32 %v562_v1, %v256_v13  ;;  %v260_v29 = vsub.f32 %v224_v21, %v552_v0  ;;  %v293_v31 = vmul.f32 %v562_v1, %v257_v20  ;;  %v261_v32 = vsub.f32 %v225_v24, %v552_v0  ;;  %v230_v39 = vld [vmem:[%s557_s21 + $0x78] sm:$0xff]  ;;  %v231_v42 = vld [vmem:[%s557_s21 + $0x80] sm:$0xff]  ;;  %v232_v45 = vld [vmem:[%s557_s21 + $0x88] sm:$0xff] }
  0x15   : > { %321 = vst.msk [vmem:[%s576_s26 + $0x8] sm:$0xff] %vm319_vm0, %v288_v18  ;;  %v294_v34 = vmul.f32 %v562_v1, %v258_v23  ;;  %v262_v35 = vsub.f32 %v226_v27, %v552_v0  ;;  %v295_v37 = vmul.f32 %v562_v1, %v259_v26  ;;  %v263_v38 = vsub.f32 %v227_v30, %v552_v0  ;;  %v233_v48 = vld [vmem:[%s557_s21 + $0x90] sm:$0xff]  ;;  %v234_v51 = vld [vmem:[%s557_s21 + $0x98] sm:$0xff]  ;;  %v235_v54 = vld [vmem:[%s557_s21 + $0xa0] sm:$0xff] }
  0x16   : > { %322 = vst.msk [vmem:[%s576_s26 + $0x10] sm:$0xff] %vm319_vm0, %v289_v19  ;;  %v296_v40 = vmul.f32 %v562_v1, %v260_v29  ;;  %v264_v41 = vsub.f32 %v228_v33, %v552_v0  ;;  %v297_v43 = vmul.f32 %v562_v1, %v261_v32  ;;  %v265_v44 = vsub.f32 %v229_v36, %v552_v0  ;;  %v236_v57 = vld [vmem:[%s557_s21 + $0xa8] sm:$0xff]  ;;  %v237_v60 = vld [vmem:[%s557_s21 + $0xb0] sm:$0xff]  ;;  %v238_v63 = vld [vmem:[%s557_s21 + $0xb8] sm:$0xff] }
  0x17   : > { %323 = vst.msk [vmem:[%s576_s26 + $0x18] sm:$0xff] %vm319_vm0, %v290_v22  ;;  %v298_v46 = vmul.f32 %v562_v1, %v262_v35  ;;  %v266_v47 = vsub.f32 %v230_v39, %v552_v0  ;;  %v299_v49 = vmul.f32 %v562_v1, %v263_v38  ;;  %v267_v50 = vsub.f32 %v231_v42, %v552_v0  ;;  %v239_v4 = vld [vmem:[%s557_s21 + $0xc0] sm:$0xff]  ;;  %v240_v7 = vld [vmem:[%s557_s21 + $0xc8] sm:$0xff]  ;;  %v241_v10 = vld [vmem:[%s557_s21 + $0xd0] sm:$0xff] }
  0x18   : > { %324 = vst.msk [vmem:[%s576_s26 + $0x20] sm:$0xff] %vm319_vm0, %v291_v25  ;;  %v300_v52 = vmul.f32 %v562_v1, %v264_v41  ;;  %v268_v53 = vsub.f32 %v232_v45, %v552_v0  ;;  %v301_v55 = vmul.f32 %v562_v1, %v265_v44  ;;  %v269_v56 = vsub.f32 %v233_v48, %v552_v0  ;;  %v242_v13 = vld [vmem:[%s557_s21 + $0xd8] sm:$0xff]  ;;  %v243_v16 = vld [vmem:[%s557_s21 + $0xe0] sm:$0xff]  ;;  %v244_v19 = vld [vmem:[%s557_s21 + $0xe8] sm:$0xff] }
  0x19   : > { %325 = vst.msk [vmem:[%s576_s26 + $0x28] sm:$0xff] %vm319_vm0, %v292_v28  ;;  %v302_v58 = vmul.f32 %v562_v1, %v266_v47  ;;  %v270_v59 = vsub.f32 %v234_v51, %v552_v0  ;;  %v303_v61 = vmul.f32 %v562_v1, %v267_v50  ;;  %v271_v62 = vsub.f32 %v235_v54, %v552_v0  ;;  %v245_v22 = vld [vmem:[%s557_s21 + $0xf0] sm:$0xff]  ;;  %v246_v25 = vld [vmem:[%s557_s21 + $0xf8] sm:$0xff] }
  0x1a   : > { %326 = vst.msk [vmem:[%s576_s26 + $0x30] sm:$0xff] %vm319_vm0, %v293_v31  ;;  %v304_v2 = vmul.f32 %v562_v1, %v268_v53  ;;  %v272_v3 = vsub.f32 %v236_v57, %v552_v0  ;;  %v305_v5 = vmul.f32 %v562_v1, %v269_v56  ;;  %v273_v6 = vsub.f32 %v237_v60, %v552_v0 }
  0x1b   : > { %327 = vst.msk [vmem:[%s576_s26 + $0x38] sm:$0xff] %vm319_vm0, %v294_v34  ;;  %v306_v8 = vmul.f32 %v562_v1, %v270_v59  ;;  %v274_v9 = vsub.f32 %v238_v63, %v552_v0  ;;  %v307_v11 = vmul.f32 %v562_v1, %v271_v62  ;;  %v275_v12 = vsub.f32 %v239_v4, %v552_v0 }
  0x1c   : > { %328 = vst.msk [vmem:[%s576_s26 + $0x40] sm:$0xff] %vm319_vm0, %v295_v37  ;;  %v308_v14 = vmul.f32 %v562_v1, %v272_v3  ;;  %v276_v15 = vsub.f32 %v240_v7, %v552_v0  ;;  %v309_v17 = vmul.f32 %v562_v1, %v273_v6  ;;  %v277_v18 = vsub.f32 %v241_v10, %v552_v0 }
  0x1d   : > { %329 = vst.msk [vmem:[%s576_s26 + $0x48] sm:$0xff] %vm319_vm0, %v296_v40  ;;  %v310_v20 = vmul.f32 %v562_v1, %v274_v9  ;;  %v278_v21 = vsub.f32 %v242_v13, %v552_v0  ;;  %v311_v23 = vmul.f32 %v562_v1, %v275_v12  ;;  %v279_v24 = vsub.f32 %v243_v16, %v552_v0 }
  0x1e   : > { %330 = vst.msk [vmem:[%s576_s26 + $0x50] sm:$0xff] %vm319_vm0, %v297_v43  ;;  %v312_v26 = vmul.f32 %v562_v1, %v276_v15  ;;  %v280_v27 = vsub.f32 %v244_v19, %v552_v0  ;;  %v313_v28 = vmul.f32 %v562_v1, %v277_v18  ;;  %v281_v29 = vsub.f32 %v245_v22, %v552_v0 }
  0x1f   : > { %331 = vst.msk [vmem:[%s576_s26 + $0x58] sm:$0xff] %vm319_vm0, %v298_v46  ;;  %v314_v30 = vmul.f32 %v562_v1, %v278_v21  ;;  %v282_v31 = vsub.f32 %v246_v25, %v552_v0  ;;  %v315_v32 = vmul.f32 %v562_v1, %v279_v24 }
  0x20   : > { %332 = vst.msk [vmem:[%s576_s26 + $0x60] sm:$0xff] %vm319_vm0, %v299_v49  ;;  %v316_v33 = vmul.f32 %v562_v1, %v280_v27  ;;  %v317_v34 = vmul.f32 %v562_v1, %v281_v29 }
  0x21   : > { %333 = vst.msk [vmem:[%s576_s26 + $0x68] sm:$0xff] %vm319_vm0, %v300_v52  ;;  %v318_v35 = vmul.f32 %v562_v1, %v282_v31 }
  0x22   : > { %334 = vst.msk [vmem:[%s576_s26 + $0x70] sm:$0xff] %vm319_vm0, %v301_v55 }
  0x23   : > { %335 = vst.msk [vmem:[%s576_s26 + $0x78] sm:$0xff] %vm319_vm0, %v302_v58 }
  0x24   : > { %336 = vst.msk [vmem:[%s576_s26 + $0x80] sm:$0xff] %vm319_vm0, %v303_v61 }
  0x25   : > { %337 = vst.msk [vmem:[%s576_s26 + $0x88] sm:$0xff] %vm319_vm0, %v304_v2 }
  0x26   : > { %338 = vst.msk [vmem:[%s576_s26 + $0x90] sm:$0xff] %vm319_vm0, %v305_v5 }
  0x27   : > { %339 = vst.msk [vmem:[%s576_s26 + $0x98] sm:$0xff] %vm319_vm0, %v306_v8 }
  0x28   : > { %340 = vst.msk [vmem:[%s576_s26 + $0xa0] sm:$0xff] %vm319_vm0, %v307_v11 }
  0x29   : > { %341 = vst.msk [vmem:[%s576_s26 + $0xa8] sm:$0xff] %vm319_vm0, %v308_v14 }
  0x2a   : > { %342 = vst.msk [vmem:[%s576_s26 + $0xb0] sm:$0xff] %vm319_vm0, %v309_v17 }
  0x2b   : > { %343 = vst.msk [vmem:[%s576_s26 + $0xb8] sm:$0xff] %vm319_vm0, %v310_v20 }
  0x2c   : > { %344 = vst.msk [vmem:[%s576_s26 + $0xc0] sm:$0xff] %vm319_vm0, %v311_v23 }
  0x2d   : > { %345 = vst.msk [vmem:[%s576_s26 + $0xc8] sm:$0xff] %vm319_vm0, %v312_v26 }
  0x2e   : > { %346 = vst.msk [vmem:[%s576_s26 + $0xd0] sm:$0xff] %vm319_vm0, %v313_v28 }
  0x2f   : > { %347 = vst.msk [vmem:[%s576_s26 + $0xd8] sm:$0xff] %vm319_vm0, %v314_v30 }
  0x30   : > { %348 = vst.msk [vmem:[%s576_s26 + $0xe0] sm:$0xff] %vm319_vm0, %v315_v32 }
  0x31   : > { %349 = vst.msk [vmem:[%s576_s26 + $0xe8] sm:$0xff] %vm319_vm0, %v316_v33 }
  0x32   : > { %350 = vst.msk [vmem:[%s576_s26 + $0xf0] sm:$0xff] %vm319_vm0, %v317_v34 }
  0x33   : > { %351 = vst.msk [vmem:[%s576_s26 + $0xf8] sm:$0xff] %vm319_vm0, %v318_v35 }
  0x34 PF: > { %s13_s14 = sadd.s32 1, %s509_s14   ;;  %s742_s12 = smov %s505_s13 }
  0x35   : > { %p10_p5 = scmp.ge.s32.totalorder %s13_s14, 4   ;;  %s743_s13 = smov %s745_s15 }
  0x37   :  { %12 = sbr.rel (!%p10_p5) target bundleno = 2 (0x2), region = 62 }

</bundles_post_ra>
